<compile_context>
chip_gen: v6e
topology: v6e:2x2x1
jax: 0.10.0
libtpu: 0.0.40
codegen_flags: <defaults>
</compile_context>

<pallas_src>
import jax
import jax.numpy as jnp
from jax.experimental import pallas as pl
from jax.experimental.pallas import tpu as pltpu


def _round_up(n, m):
    return ((n + m - 1) // m) * m


def _sublane(dtype):
    # f32 -> 8, bf16 -> 16, int8/fp8 -> 32.
    return max(8, 32 // jnp.dtype(dtype).itemsize)


def mlp_kernel(x_ref, w1_ref, w2_ref, o_ref):
    # x_ref:  (TM, 10)  input tile (streamed over the batch grid)
    # w1_ref: (10, 20)  fc1.weight^T, VMEM-resident (constant index_map)
    # w2_ref: (20, 2)   fc2.weight^T, VMEM-resident (constant index_map)
    # o_ref:  (TM, 2)   output tile
    h = jnp.maximum(
        jnp.dot(x_ref[...], w1_ref[...], preferred_element_type=jnp.float32),
        0.0)
    y = jnp.maximum(
        jnp.dot(h, w2_ref[...], preferred_element_type=jnp.float32),
        0.0)
    o_ref[...] = y.astype(o_ref.dtype)


def _choose_tm(B, sublane, tm_cap=1024):
    if B <= sublane:
        # One block covering the whole (tiny) batch: block dim == array dim.
        return B
    # >= 2 grid steps (keeps both v7x TensorCores busy) with as large a tile
    # as that allows, capped at 1024 (past the step-overhead knee).  Deriving
    # TM from B also avoids up-to-2x padded-row overshoot.
    tm = _round_up(pl.cdiv(B, 2), sublane)
    return max(sublane, min(tm_cap, tm))


def dummy_model_forward(x, w1, w2, *, tm_cap=1024):
    """x: (B, 10); w1: (20, 10) = fc1.weight; w2: (2, 20) = fc2.weight.

    Returns relu(relu(x @ w1.T) @ w2.T), shape (B, 2), matching DummyModel.
    """
    B, d_in = x.shape
    d_hid = w1.shape[0]
    d_out = w2.shape[0]

    # Tiny, static weights: transpose once in the wrapper to (in, out) layout.
    w1_t = w1.T    # (10, 20)
    w2_t = w2.T    # (20, 2)

    sublane = _sublane(x.dtype)
    tm = _choose_tm(B, sublane, tm_cap)
    grid = (pl.cdiv(B, tm),)   # ragged final block handled by Pallas masking

    itemsize = jnp.dtype(x.dtype).itemsize
    flops = 2 * B * (d_in * d_hid + d_hid * d_out)
    bytes_accessed = itemsize * (
        B * d_in + d_in * d_hid + d_hid * d_out + B * d_out)

    return pl.pallas_call(
        mlp_kernel,
        out_shape=jax.ShapeDtypeStruct((B, d_out), x.dtype),
        grid=grid,
        in_specs=[
            # Batch-tiled input stream; last dim is the full feature dim (10).
            pl.BlockSpec((tm, d_in), lambda i: (i, 0)),
            # Weights: same block every step -> loaded once, VMEM-resident.
            pl.BlockSpec((d_in, d_hid), lambda i: (0, 0)),
            pl.BlockSpec((d_hid, d_out), lambda i: (0, 0)),
        ],
        out_specs=pl.BlockSpec((tm, d_out), lambda i: (i, 0)),
        compiler_params=pltpu.CompilerParams(
            dimension_semantics=("parallel",)),
        cost_estimate=pl.CostEstimate(
            flops=flops, transcendentals=0, bytes_accessed=bytes_accessed),
    )(x, w1_t, w2_t)


def _reference(x, w1, w2):
    return jnp.maximum(jnp.maximum(x @ w1.T, 0.0) @ w2.T, 0.0)


if __name__ == "__main__":
    key = jax.random.PRNGKey(0)
    k_x, k_w1, k_w2 = jax.random.split(key, 3)

    D_IN, D_HID, D_OUT = 10, 20, 2
    # PyTorch nn.Linear(bias=False) weight shapes: fc1 (20, 10), fc2 (2, 20).
    w1 = jax.random.normal(k_w1, (D_HID, D_IN), dtype=jnp.float32) * 0.1
    w2 = jax.random.normal(k_w2, (D_OUT, D_HID), dtype=jnp.float32) * 0.1

    # Exercise: tiny single-block batch, multi-step even batch, ragged batch.
    for B in (2, 96, 50):
        x = jax.random.normal(jax.random.fold_in(k_x, B), (B, D_IN),
                              dtype=jnp.float32)
        out = jax.block_until_ready(dummy_model_forward(x, w1, w2))
        ref = _reference(x, w1, w2)
        assert out.shape == (B, D_OUT), (B, out.shape)
        assert jnp.allclose(out, ref, atol=1e-5, rtol=1e-5), (B, out, ref)

    print("KERNEL_OK")
</pallas_src>

<mosaic_0001>
module attributes {stable_mosaic.version = 11 : i64} {
  func.func @mlp_kernel(%arg0: i32, %arg1: memref<2x10xf32, #tpu.memory_space<vmem>>, %arg2: memref<10x20xf32, #tpu.memory_space<vmem>>, %arg3: memref<20x2xf32, #tpu.memory_space<vmem>>, %arg4: memref<2x2xf32, #tpu.memory_space<vmem>>) attributes {dimension_semantics = [#tpu.dimension_semantics<parallel>], iteration_bounds = array<i64: 1>, scalar_prefetch = 0 : i64, scratch_operands = 0 : i64, tpu.core_type = #tpu.core_type<tc>, window_params = [{transform_indices = @transform_0, window_bounds = array<i64: 2, 10>}, {pipeline_mode = #tpu.pipeline_mode<synchronous>, transform_indices = @transform_1, window_bounds = array<i64: 10, 20>}, {pipeline_mode = #tpu.pipeline_mode<synchronous>, transform_indices = @transform_2, window_bounds = array<i64: 20, 2>}, {transform_indices = @transform_3, window_bounds = array<i64: 2, 2>}]} {
    %c0 = arith.constant 0 : index
    %c0_0 = arith.constant 0 : index
    %0 = vector.load %arg1[%c0, %c0_0] : memref<2x10xf32, #tpu.memory_space<vmem>>, vector<2x10xf32>
    %c0_1 = arith.constant 0 : index
    %c0_2 = arith.constant 0 : index
    %1 = vector.load %arg2[%c0_1, %c0_2] : memref<10x20xf32, #tpu.memory_space<vmem>>, vector<10x20xf32>
    %cst = arith.constant dense<0.000000e+00> : vector<2x20xf32>
    %2 = tpu.matmul %0, %1, %cst {dimension_numbers = #tpu.dot_dimension_numbers<[1], [0], [0], [1], [0, 0, 1, 1], [], []>} : vector<2x10xf32>, vector<10x20xf32>, vector<2x20xf32> -> vector<2x20xf32>
    %cst_3 = arith.constant 0.000000e+00 : f32
    %3 = vector.broadcast %cst_3 : f32 to vector<2x20xf32>
    %4 = arith.maximumf %2, %3 : vector<2x20xf32>
    %c0_4 = arith.constant 0 : index
    %c0_5 = arith.constant 0 : index
    %5 = vector.load %arg3[%c0_4, %c0_5] : memref<20x2xf32, #tpu.memory_space<vmem>>, vector<20x2xf32>
    %cst_6 = arith.constant dense<0.000000e+00> : vector<2x2xf32>
    %6 = tpu.matmul %4, %5, %cst_6 {dimension_numbers = #tpu.dot_dimension_numbers<[1], [0], [0], [1], [0, 0, 1, 1], [], []>} : vector<2x20xf32>, vector<20x2xf32>, vector<2x2xf32> -> vector<2x2xf32>
    %cst_7 = arith.constant 0.000000e+00 : f32
    %7 = vector.broadcast %cst_7 : f32 to vector<2x2xf32>
    %8 = arith.maximumf %6, %7 : vector<2x2xf32>
    %c0_8 = arith.constant 0 : index
    %c0_9 = arith.constant 0 : index
    %9 = vector.load %arg4[%c0_8, %c0_9] : memref<2x2xf32, #tpu.memory_space<vmem>>, vector<2x2xf32>
    tpu.vector_store %arg4[%c0_8, %c0_9], %8 {strides = array<i32>} : memref<2x2xf32, #tpu.memory_space<vmem>>, vector<2x2xf32>,
    return
  }
  func.func @transform_0(%arg0: i32) -> (i32, i32) {
    %c0_i32 = arith.constant 0 : i32
    %c0_i32_0 = arith.constant 0 : i32
    return %arg0, %c0_i32 : i32, i32
  }
  func.func @transform_1(%arg0: i32) -> (i32, i32) {
    %c0_i32 = arith.constant 0 : i32
    %c0_i32_0 = arith.constant 0 : i32
    %c0_i32_1 = arith.constant 0 : i32
    return %c0_i32, %c0_i32_0 : i32, i32
  }
  func.func @transform_2(%arg0: i32) -> (i32, i32) {
    %c0_i32 = arith.constant 0 : i32
    %c0_i32_0 = arith.constant 0 : i32
    %c0_i32_1 = arith.constant 0 : i32
    return %c0_i32, %c0_i32_0 : i32, i32
  }
  func.func @transform_3(%arg0: i32) -> (i32, i32) {
    %c0_i32 = arith.constant 0 : i32
    %c0_i32_0 = arith.constant 0 : i32
    return %arg0, %c0_i32 : i32, i32
  }
}

</mosaic_0001>

<bundles_post_ra>
// kernel: tpu_custom_call.1
= control target key start
LH: loop header
LB: loop body
LE: loop exit
PB: predicated region body
PF: predicated region fallthrough
CT: control target
= control target key end

     0   :  { %vm22_vm0 = vcmask 1041408   ;;  %v247_v1 = vmov 0.0   ;;  %vm248_vm1 = vmmov 0   ;;  %vm104_vm2 = vcmask 1043456   ;;  %s291_s0 = inlined_call_operand.vmem [shape: f32[2,10], index: 0, kind: input, shape index: {}]   ;;  %s292_s1 = inlined_call_operand.vmem [shape: f32[10,20], index: 1, kind: input, shape index: {}]   ;;  %s293_s2 = inlined_call_operand.vmem [shape: f32[20,2], index: 2, kind: input, shape index: {}]   ;;  %s294_s3 = inlined_call_operand.hbm [shape: f32[2,2], index: 3, kind: output, shape index: {}]  }
   0x1   :  { %v17_v0 = vld [vmem:[%s292_s1 + $0x8] sm:$0x3]  ;;  %206 = vmatprep.subr.mxu0 %v247_v1  ;;  %v16_v2 = vld [vmem:[%s292_s1] sm:$0xff]  ;;  %210 = vmatprep.mubr.msk.f32.mxu0 %vm248_vm1, %v247_v1  ;;  %v99_v3 = vld [vmem:[%s293_s2 + $0x10] sm:$0xf]  ;;  %vm18_vm3 = vcmask 80896  }
   0x2   :  { %207 = vmatpush3.msk.msra.mxu0 %vm22_vm0, %v17_v0  ;;  %v15_v4 = vld [vmem:[%s291_s0] sm:$0x3]  ;;  %213 = vmatprep.subr.mxu1 %v247_v1 }
   0x3   :  { %8 = vsyncpa [#allocation3], 0  ;;  %208 = vmatprep.subr.mxu0 %v247_v1  ;;  %214 = vmatpush3.msk.msra.mxu1 %vm104_vm2, %v99_v3  ;;  %v98_v5 = vld [vmem:[%s293_s2 + $0x8] sm:$0xff]  ;;  %v97_v6 = vld [vmem:[%s293_s2] sm:$0xff]  ;;  %vm100_vm4 = vcmask 162816   ;;  %s249_s0 = smov [#allocation2]  }
   0x4   :  { %209 = vmatpush3.msra.mxu0 %v16_v2  ;;  %215 = vmatprep.subr.mxu1 %v247_v1  ;;  %s187_s23 = sshll.u32 %s249_s0, 4  ;;  %vm179_vm5 = vcmask 9216   ;;  %s188_s23 = int_to_ptr.vmem [resolvable:$true] %s187_s23 }
   0x5   :  { %211 = vmatmul.mubr.msk.f32.vlgmr.msra.gmra.mxu0 %vm18_vm3, %v15_v4  ;;  %219 = vmatprep.mubr.msk.f32.mxu1 %vm248_vm1, %v247_v1  ;;  %s225_s24 = scalar_lea.vmem %s188_s23, 32  ;;  %p230_p1 = scmp.lt.s32.totalorder %s188_s23, %s188_s23 }
   0x6   :  { %216 = vmatpush3.msra.mxu1 %v98_v5  ;;  %p226_p0 = scmp.ne.s32.totalorder %s188_s23, %s225_s24  ;;  %p231_p2 = scmp.lt.s32.totalorder %s225_s24, %s225_s24 }
   0x7   :  { %217 = vmatprep.subr.mxu1 %v247_v1 }
   0x8   :  { %218 = vmatpush3.msra.mxu1 %v97_v6  ;;  %p232_p3 = por %p231_p2, %p230_p1 }
   0xa   :  { %p233_p4 = pnand %p232_p3, %p226_p0 }
  0xc5   :  { %v92_v7 = vpop.f32.mrf.mxu0 }
  0xc6   :  { %v96_v8 = vmax.f32 %v92_v7, 0.0 }
  0xc7   :  { %v212_v9 = vpop.f32.mrf.mxu0 }
  0xc8   :  { %220 = vmatmul.mubr.msk.f32.vlgmr.msra.gmra.mxu1 %vm100_vm4, %v96_v8 }
 0x188   :  { %v174_v10 = vpop.f32.mrf.mxu1 }
 0x189   :  { %v178_v11 = vmax.f32 %v174_v10, 0.0 }
 0x18a   :  { %v221_v12 = vpop.f32.mrf.mxu1 }
 0x18b   :  { %180 = vst.msk [vmem:[#allocation2] sm:$0x3] %vm179_vm5, %v178_v11 }
 0x18c   :  { %236 = shalt.err (!%p233_p4)
}
 0x18d   :  { %190 = dma.vmem_to_hbm [thread:$0]  %s188_s23, 32, %s294_s3, [#allocation3]  }
 0x18e   :  { %245 = dma.done.wait [#allocation3], 32  }
 0x18f   :  { %246 = vsyncadd [#allocation3], 4294967264 }
 0x190   :  { %194 = vsyncpa [#allocation3], 1 }

</bundles_post_ra>
